<compile_context>
chip_gen: v7x
topology: tpu7x:2x2x1
jax: 0.10.0
libtpu: 0.0.40
codegen_flags: <defaults>
</compile_context>

<pallas_src>
import math
import functools

import jax
import jax.numpy as jnp
from jax import lax
from jax.experimental import pallas as pl
from jax.experimental.pallas import tpu as pltpu


# ----------------------------- Pallas kernels ------------------------------


def _qkv_proj_kernel(x_ref, w_ref, o_ref):
    # x: (M, K), w: (K, 3N)  ->  o = x @ w   (fused Q/K/V projection, no bias)
    o_ref[...] = jnp.dot(
        x_ref[...], w_ref[...], preferred_element_type=jnp.float32
    ).astype(o_ref.dtype)


def qkv_projection_pallas(x, w_qkv):
    """Fused y = x @ W_qkv with W_qkv already in (d_in, 3*d_out) layout
    (concatenated + transposed once, outside the forward).
    x: (bs, seq, d_model) -> q, k, v each (bs, seq, d_model)."""
    bs, seq, d_model = x.shape
    n_out = w_qkv.shape[1]
    x2 = x.reshape(bs * seq, d_model)
    y = pl.pallas_call(
        _qkv_proj_kernel,
        out_shape=jax.ShapeDtypeStruct((bs * seq, n_out), x.dtype),
        grid=(1,),
        in_specs=[
            pl.BlockSpec((bs * seq, d_model), lambda i: (0, 0)),
            pl.BlockSpec((d_model, n_out), lambda i: (0, 0)),
        ],
        out_specs=pl.BlockSpec((bs * seq, n_out), lambda i: (0, 0)),
    )(x2, w_qkv)
    y = y.reshape(bs, seq, n_out)
    q, k, v = jnp.split(y, 3, axis=-1)
    return q, k, v


def _attention_kernel(q_ref, k_ref, v_ref, pm_ref, o_ref, *, n_heads, dph, scale):
    # blocks (per batch element): q (1,qlen,d_model), k/v (1,klen,d_model),
    # pm (1,1,klen), o (1,qlen,d_model)
    q = q_ref[0]          # (qlen, d_model)
    k = k_ref[0]          # (klen, d_model)
    v = v_ref[0]          # (klen, d_model)
    pm = pm_ref[0]        # (1, klen)

    qlen = q.shape[0]
    klen = k.shape[0]

    # combined causal (last qlen rows of tril(klen,klen)) + padding boolean mask
    row = lax.broadcasted_iota(jnp.int32, (qlen, klen), 0)
    col = lax.broadcasted_iota(jnp.int32, (qlen, klen), 1)
    causal = col <= row + (klen - qlen)
    keep = jnp.logical_and(causal, pm > 0.5)        # (qlen, klen) via broadcast

    # contract last dim of q with last dim of k -> no explicit k.T in kernel
    dn = (((1,), (1,)), ((), ()))

    outs = []
    for h in range(n_heads):                        # static unroll; all heads resident in VMEM
        sl = slice(h * dph, (h + 1) * dph)
        qh = q[:, sl]
        kh = k[:, sl]
        vh = v[:, sl]

        scores = lax.dot_general(qh, kh, dn, preferred_element_type=jnp.float32) * scale
        # additive -10000 mask (matches the torch reference: scores + (1-mask)*-1e4)
        scores = jnp.where(keep, scores, scores - 10000.0)

        scores = scores - jnp.max(scores, axis=-1, keepdims=True)
        p = jnp.exp(scores)
        p = p * pl.reciprocal(jnp.sum(p, axis=-1, keepdims=True), approx=True)

        # TODO(synk): dropout on attention probs omitted (config.dropout_rate = 0.0).
        outs.append(
            jnp.dot(p.astype(vh.dtype), vh, preferred_element_type=jnp.float32)
        )

    # heads concatenated along the feature dim == unshape(); single lane-dense store
    o_ref[0] = jnp.concatenate(outs, axis=-1).astype(o_ref.dtype)


def attention_pallas(q, keys, values, padding_mask, n_heads):
    """q: (bs, qlen, d_model); keys/values: (bs, klen, d_model);
    padding_mask: (bs, klen). Heads are split inside the kernel, so no
    (0,2,1,3) transposes are needed around the call."""
    bs, qlen, d_model = q.shape
    klen = keys.shape[1]
    dph = d_model // n_heads
    scale = 1.0 / math.sqrt(dph)
    pm3 = padding_mask.astype(jnp.float32).reshape(bs, 1, klen)

    return pl.pallas_call(
        functools.partial(_attention_kernel, n_heads=n_heads, dph=dph, scale=scale),
        out_shape=jax.ShapeDtypeStruct((bs, qlen, d_model), q.dtype),
        grid=(bs,),
        in_specs=[
            pl.BlockSpec((1, qlen, d_model), lambda b: (b, 0, 0)),
            pl.BlockSpec((1, klen, d_model), lambda b: (b, 0, 0)),
            pl.BlockSpec((1, klen, d_model), lambda b: (b, 0, 0)),
            pl.BlockSpec((1, 1, klen), lambda b: (b, 0, 0)),
        ],
        out_specs=pl.BlockSpec((1, qlen, d_model), lambda b: (b, 0, 0)),
        compiler_params=pltpu.CompilerParams(
            # batch axis parallel -> both TensorCores get work on v7x
            dimension_semantics=("parallel",)
        ),
    )(q, keys, values, pm3)


# ----------------------------- DecAttention forward ------------------------------


def dec_attention_forward(params, cache_k, cache_v, query, key, value, padding_mask,
                          start_pos=0, n_heads=4):
    """Eval-mode DecAttention.forward. Returns (context, new_cache_k, new_cache_v).

    NOTE: the fused QKV projection assumes decoder self-attention
    (query is key is value), which is how DecAttention is used.
    """
    del key, value  # self-attention: q/k/v all projected from the same hidden states
    bs, qlen, d_model = query.shape

    # fused Q/K/V projection (single Pallas matmul, pre-transposed fused weight)
    q, k_new, v_new = qkv_projection_pallas(query, params["w_qkv"])

    # KV-cache update (glue)
    cache_k = lax.dynamic_update_slice(cache_k, k_new, (0, start_pos, 0))
    cache_v = lax.dynamic_update_slice(cache_v, v_new, (0, start_pos, 0))
    klen = start_pos + qlen
    keys = cache_k[:bs, :klen]
    values = cache_v[:bs, :klen]

    # attention over all heads, one grid step per batch element, lane-dense output
    ctx = attention_pallas(q, keys, values, padding_mask, n_heads)  # (bs, qlen, d_model)
    return ctx, cache_k, cache_v


# ----------------------------- reference (plain JAX) ------------------------------


def dec_attention_reference(params, cache_k, cache_v, query, key, value, padding_mask,
                            start_pos=0, n_heads=4):
    bs, qlen, d_model = query.shape
    dph = d_model // n_heads
    q = query @ params["q_w"].T
    k_new = key @ params["k_w"].T
    v_new = value @ params["v_w"].T
    cache_k = lax.dynamic_update_slice(cache_k, k_new, (0, start_pos, 0))
    cache_v = lax.dynamic_update_slice(cache_v, v_new, (0, start_pos, 0))
    klen = start_pos + qlen
    keys = cache_k[:bs, :klen]
    values = cache_v[:bs, :klen]
    qh = q.reshape(bs, qlen, n_heads, dph).transpose(0, 2, 1, 3)
    kh = keys.reshape(bs, klen, n_heads, dph).transpose(0, 2, 1, 3)
    vh = values.reshape(bs, klen, n_heads, dph).transpose(0, 2, 1, 3)
    scores = jnp.einsum("bhqd,bhkd->bhqk", qh, kh) / math.sqrt(dph)
    tril = jnp.tril(jnp.ones((klen, klen), jnp.float32))[-qlen:, :]
    mask = tril[None, None] * padding_mask.astype(jnp.float32)[:, None, None, :]
    scores = scores + (1.0 - mask) * -10000.0
    probs = jax.nn.softmax(scores, axis=-1)
    ctx = jnp.einsum("bhqk,bhkd->bhqd", probs, vh)
    return ctx.transpose(0, 2, 1, 3).reshape(bs, qlen, d_model)


# ----------------------------- main ------------------------------


if __name__ == "__main__":
    # small config
    bs, seq, d_model, n_heads = 2, 8, 32, 4
    max_batch_size, max_position = 2, 16
    start_pos = 0

    key0 = jax.random.PRNGKey(0)
    k1, k2, k3, k4 = jax.random.split(key0, 4)

    # deterministic nn.Linear-style weights (use_bias=False): U(-1/sqrt(d), 1/sqrt(d))
    bound = 1.0 / math.sqrt(d_model)
    q_w = jax.random.uniform(k1, (d_model, d_model), jnp.float32, -bound, bound)
    k_w = jax.random.uniform(k2, (d_model, d_model), jnp.float32, -bound, bound)
    v_w = jax.random.uniform(k3, (d_model, d_model), jnp.float32, -bound, bound)

    params = {
        "q_w": q_w, "k_w": k_w, "v_w": v_w,
        # fused weight built ONCE, already transposed to (d_in, 3*d_out) layout
        "w_qkv": jnp.concatenate([q_w.T, k_w.T, v_w.T], axis=1),
    }

    x = jax.random.normal(k4, (bs, seq, d_model), jnp.float32)
    query = key = value = x  # decoder self-attention
    # padding mask: last two key positions of batch 1 are padding
    padding_mask = jnp.ones((bs, start_pos + seq), jnp.float32)
    padding_mask = padding_mask.at[1, -2:].set(0.0)

    cache_k = jnp.zeros((max_batch_size, max_position, d_model), jnp.float32)
    cache_v = jnp.zeros((max_batch_size, max_position, d_model), jnp.float32)

    ctx, new_ck, new_cv = dec_attention_forward(
        params, cache_k, cache_v, query, key, value, padding_mask,
        start_pos=start_pos, n_heads=n_heads)
    ctx = jax.block_until_ready(ctx)

    ref = dec_attention_reference(
        params, cache_k, cache_v, query, key, value, padding_mask,
        start_pos=start_pos, n_heads=n_heads)

    assert ctx.shape == (bs, seq, d_model)
    # slightly looser tolerance: softmax denominator uses EUP approx reciprocal (~2^-12 rel err)
    assert jnp.allclose(ctx, ref, atol=2e-3, rtol=2e-3), "mismatch vs reference"

    print("KERNEL_OK")
</pallas_src>

<mosaic_0001>
module attributes {stable_mosaic.version = 11 : i64} {
  func.func @_qkv_proj_kernel(%arg0: i32, %arg1: memref<16x32xf32, #tpu.memory_space<vmem>>, %arg2: memref<32x96xf32, #tpu.memory_space<vmem>>, %arg3: memref<16x96xf32, #tpu.memory_space<vmem>>) attributes {dimension_semantics = [#tpu.dimension_semantics<arbitrary>], iteration_bounds = array<i64: 1>, scalar_prefetch = 0 : i64, scratch_operands = 0 : i64, tpu.core_type = #tpu.core_type<tc>, window_params = [{pipeline_mode = #tpu.pipeline_mode<synchronous>, transform_indices = @transform_0, window_bounds = array<i64: 16, 32>}, {pipeline_mode = #tpu.pipeline_mode<synchronous>, transform_indices = @transform_1, window_bounds = array<i64: 32, 96>}, {pipeline_mode = #tpu.pipeline_mode<synchronous>, transform_indices = @transform_2, window_bounds = array<i64: 16, 96>}]} {
    %c0 = arith.constant 0 : index
    %c0_0 = arith.constant 0 : index
    %0 = vector.load %arg1[%c0, %c0_0] : memref<16x32xf32, #tpu.memory_space<vmem>>, vector<16x32xf32>
    %c0_1 = arith.constant 0 : index
    %c0_2 = arith.constant 0 : index
    %1 = vector.load %arg2[%c0_1, %c0_2] : memref<32x96xf32, #tpu.memory_space<vmem>>, vector<32x96xf32>
    %cst = arith.constant dense<0.000000e+00> : vector<16x96xf32>
    %2 = tpu.matmul %0, %1, %cst {dimension_numbers = #tpu.dot_dimension_numbers<[1], [0], [0], [1], [0, 0, 1, 1], [], []>} : vector<16x32xf32>, vector<32x96xf32>, vector<16x96xf32> -> vector<16x96xf32>
    %c0_3 = arith.constant 0 : index
    %c0_4 = arith.constant 0 : index
    %3 = vector.load %arg3[%c0_3, %c0_4] : memref<16x96xf32, #tpu.memory_space<vmem>>, vector<16x96xf32>
    tpu.vector_store %arg3[%c0_3, %c0_4], %2 {strides = array<i32>} : memref<16x96xf32, #tpu.memory_space<vmem>>, vector<16x96xf32>,
    return
  }
  func.func @transform_0(%arg0: i32) -> (i32, i32) {
    %c0_i32 = arith.constant 0 : i32
    %c0_i32_0 = arith.constant 0 : i32
    %c0_i32_1 = arith.constant 0 : i32
    return %c0_i32, %c0_i32_0 : i32, i32
  }
  func.func @transform_1(%arg0: i32) -> (i32, i32) {
    %c0_i32 = arith.constant 0 : i32
    %c0_i32_0 = arith.constant 0 : i32
    %c0_i32_1 = arith.constant 0 : i32
    return %c0_i32, %c0_i32_0 : i32, i32
  }
  func.func @transform_2(%arg0: i32) -> (i32, i32) {
    %c0_i32 = arith.constant 0 : i32
    %c0_i32_0 = arith.constant 0 : i32
    %c0_i32_1 = arith.constant 0 : i32
    return %c0_i32, %c0_i32_0 : i32, i32
  }
}

</mosaic_0001>

<bundles_post_ra>
// kernel: tpu_custom_call.1
= control target key start
LH: loop header
LB: loop body
LE: loop exit
PB: predicated region body
PF: predicated region fallthrough
CT: control target
= control target key end

     0   :  { %7 = vsyncpa [#allocation3], 0  ;;  %s318_s0 = inlined_call_operand.hbm [shape: f32[16,32], index: 0, kind: input, shape index: {}]   ;;  %s319_s1 = inlined_call_operand.hbm [shape: f32[32,96], index: 1, kind: input, shape index: {}]   ;;  %s320_s2 = inlined_call_operand.hbm [shape: f32[16,96], index: 2, kind: output, shape index: {}]  }
   0x1   :  { %8 = vsyncpa [#allocation6], 0 }
   0x2   :  { %9 = vsyncpa [#allocation4], 0  ;;  %s253_s9 = smov [#allocation2]   ;;  %s181_s13 = scalar_lea.hbm %s318_s0, 256 }
   0x3   :  { %s15_s10 = sshll.u32 %s253_s9, 4  ;;  %p182_p0 = scmp.ne.s32.totalorder %s318_s0, %s181_s13  ;;  %s16_s10 = int_to_ptr.vmem [resolvable:$true] %s15_s10 }
   0x4   :  { %p185_p1 = scmp.lt.u32.totalorder %s181_s13, %s318_s0 }
   0x6   :  { %p187_p2 = pnand %p185_p1, %p182_p0 }
   0x8   :  { %190 = shalt.err (!%p187_p2)
}
   0x9   :  { %s191_s18 = scalar_lea.vmem %s16_s10, 256  ;;  %p196_p4 = scmp.lt.s32.totalorder %s16_s10, %s16_s10 }
   0xa   :  { %p192_p3 = scmp.ne.s32.totalorder %s16_s10, %s191_s18  ;;  %p197_p5 = scmp.lt.s32.totalorder %s191_s18, %s191_s18 }
   0xc   :  { %p198_p6 = por %p197_p5, %p196_p4 }
   0xe   :  { %p199_p7 = pnand %p198_p6, %p192_p3 }
  0x10   :  { %202 = shalt.err (!%p199_p7)
}
  0x11   :  { %s254_s19 = smov 128   ;;  %s255_s20 = smov 8  }
  0x12   :  { %21 = dma.hbm_to_vmem [thread:$0]  %s318_s0, 256, %s16_s10, [#allocation3], %s254_s19, %s254_s19, %s255_s20  }
  0x13   :  { %s256_s23 = smov [#allocation5]   ;;  %s203_s27 = scalar_lea.hbm %s319_s1, 512 }
  0x14   :  { %s27_s24 = sshll.u32 %s256_s23, 4  ;;  %p204_p8 = scmp.ne.s32.totalorder %s319_s1, %s203_s27  ;;  %s28_s24 = int_to_ptr.vmem [resolvable:$true] %s27_s24 }
  0x15   :  { %p207_p9 = scmp.lt.u32.totalorder %s203_s27, %s319_s1 }
  0x17   :  { %p209_p10 = pnand %p207_p9, %p204_p8 }
  0x19   :  { %212 = shalt.err (!%p209_p10)
}
  0x1a   :  { %s213_s4 = scalar_lea.vmem %s28_s24, 512  ;;  %p218_p12 = scmp.lt.s32.totalorder %s28_s24, %s28_s24 }
  0x1b   :  { %p214_p11 = scmp.ne.s32.totalorder %s28_s24, %s213_s4  ;;  %p219_p13 = scmp.lt.s32.totalorder %s213_s4, %s213_s4 }
  0x1d   :  { %p220_p0 = por %p219_p13, %p218_p12 }
  0x1f   :  { %p221_p1 = pnand %p220_p0, %p214_p11 }
  0x21   :  { %224 = shalt.err (!%p221_p1)
}
  0x22   :  { %33 = dma.hbm_to_vmem [thread:$0]  %s319_s1, 512, %s28_s24, [#allocation6], %s254_s19, %s254_s19, %s255_s20  }
  0x23   :  { %247 = dma.done.wait [#allocation3], 256  }
  0x24   :  { %248 = vsyncadd [#allocation3], 4294967040 }
  0x25   :  { %249 = dma.done.wait [#allocation6], 512  }
  0x26   :  { %250 = vsyncadd [#allocation6], 4294966784  ;;  %vm46_vm0 = vcmask 261120   ;;  %v42_v0 = vld [vmem:[#allocation5] sm:$0xff]  ;;  %v43_v1 = vld [vmem:[#allocation5 + $0x8] sm:$0xff]  ;;  %s257_s1 = smov [#allocation7]  }
  0x27   :  { %v44_v2 = vld [vmem:[#allocation5 + $0x10] sm:$0xff]  ;;  %v168_v3 = vpack.c.bf16 %v43_v1, %v42_v0  ;;  %v45_v4 = vld [vmem:[#allocation5 + $0x18] sm:$0xff]  ;;  %s136_s6 = sshll.u32 %s257_s1, 4  ;;  %vm128_vm1 = vcmask 785408   ;;  %s137_s6 = int_to_ptr.vmem [resolvable:$true] %s136_s6 }
  0x28   :  { %v40_v5 = vld [vmem:[#allocation2] sm:$0xff]  ;;  %v172_v6 = vpack.c.bf16 %v45_v4, %v44_v2  ;;  %v41_v7 = vld [vmem:[#allocation2 + $0x8] sm:$0xff]  ;;  %s225_s7 = scalar_lea.vmem %s137_s6, 256  ;;  %p230_p3 = scmp.lt.s32.totalorder %s137_s6, %s137_s6 }
  0x29   :  { %165 = vmatprep.mubr.msk.f32.mxu0 %vm46_vm0, %v40_v5  ;;  %169 = vmatprep.subr.bf16.mxu0 %v168_v3  ;;  %p226_p2 = scmp.ne.s32.totalorder %s137_s6, %s225_s7  ;;  %p231_p4 = scmp.lt.s32.totalorder %s225_s7, %s225_s7 }
  0x2a   :  { %171 = vmatpush3.bf16.msra.mxu0 %v168_v3 }
  0x2b   :  { %173 = vmatprep.subr.bf16.mxu0 %v172_v6  ;;  %p232_p5 = por %p231_p4, %p230_p3 }
  0x2d   :  { %p233_p6 = pnand %p232_p5, %p226_p2 }
  0x2e   :  { %175 = vmatpush3.bf16.msra.mxu0 %v172_v6 }
  0x31   :  { %166 = vmatmul.mubr.msk.f32.vlgmr.msra.gmra.mrb[0].mxu0 %vm46_vm0, %v41_v7 }
 0x104   :  { %v167_v8 = vpop.f32.mrb[0].mxu0 }
 0x105   :  { %130 = vst.msk [vmem:[#allocation7 + $0x8] sm:$0xff] %vm128_vm1, %v167_v8  ;;  %v119_v9 = vpop.f32.mrb[1].mxu0 }
 0x106   :  { %129 = vst.msk [vmem:[#allocation7] sm:$0xff] %vm128_vm1, %v119_v9 }
 0x107   :  { %236 = shalt.err (!%p233_p6)
}
 0x108   :  { %s237_s10 = scalar_lea.hbm %s320_s2, 256 }
 0x109   :  { %p238_p7 = scmp.ne.s32.totalorder %s320_s2, %s237_s10  ;;  %p241_p8 = scmp.lt.u32.totalorder %s237_s10, %s320_s2 }
 0x10b   :  { %p243_p9 = pnand %p241_p8, %p238_p7 }
 0x10d   :  { %246 = shalt.err (!%p243_p9)
}
 0x10e   :  { %142 = dma.vmem_to_hbm [thread:$0]  %s137_s6, 256, %s320_s2, [#allocation4], %s254_s19, %s254_s19, %s255_s20  }
 0x10f   :  { %251 = dma.done.wait [#allocation4], 256  }
 0x110   :  { %252 = vsyncadd [#allocation4], 4294967040 }
 0x111   :  { %146 = vsyncpa [#allocation3], 1 }
 0x112   :  { %147 = vsyncpa [#allocation6], 1 }
 0x113   :  { %148 = vsyncpa [#allocation4], 1 }

</bundles_post_ra>
